<compile_context>
chip_gen: v7x
topology: tpu7x:2x2x1
jax: 0.10.0
libtpu: 0.0.40
codegen_flags: <defaults>
</compile_context>

<pallas_src>
import jax
import jax.numpy as jnp
from jax.experimental import pallas as pl
from jax.experimental.pallas import tpu as pltpu


# --------------------------------------------------------------------------
# helpers
# --------------------------------------------------------------------------

def _round_up(x, m):
    return (x + m - 1) // m * m


def _vmem_budget_bytes():
    """Usable VMEM budget (with headroom) for sizing blocks / limits."""
    cap = 64 * 1024 * 1024  # conservative default (v7x per-TensorCore)
    try:
        cap = int(pltpu.get_tpu_info().vmem_capacity_bytes)
    except Exception:
        pass
    return int(cap * 0.75)


def _prep_weights(w1, b1, w2, b2, C, C_pad, hw):
    """Split conv weights into pre/post halves, fold 1/HW into w1, pad C."""
    Cr = w1.shape[0]
    inv = 1.0 / float(hw)
    w1 = w1.astype(jnp.float32)
    w2 = w2.astype(jnp.float32)
    pad_c = C_pad - C
    # (C_pad, Cr): column-vector channel sums broadcast over the Cr lanes.
    w1p = jnp.pad(jnp.transpose(w1[:, :C]) * inv, ((0, pad_c), (0, 0)))
    w1q = jnp.pad(jnp.transpose(w1[:, C:]) * inv, ((0, pad_c), (0, 0)))
    b1r = b1.astype(jnp.float32).reshape(1, Cr)
    w2p = jnp.pad(w2[:C, :], ((0, pad_c), (0, 0)))
    w2q = jnp.pad(w2[C:, :], ((0, pad_c), (0, 0)))
    b2p = jnp.pad(b2[:C].astype(jnp.float32).reshape(C, 1), ((0, pad_c), (0, 0)))
    b2q = jnp.pad(b2[C:].astype(jnp.float32).reshape(C, 1), ((0, pad_c), (0, 0)))
    return w1p, w1q, b1r, w2p, w2q, b2p, b2q


# --------------------------------------------------------------------------
# kernels
# --------------------------------------------------------------------------

def _fused_kernel(pre_ref, post_ref, w1p_ref, w1q_ref, b1_ref,
                  w2p_ref, w2q_ref, b2p_ref, b2q_ref, out_ref):
    """Full-image-resident path: one grid step per batch element."""
    pre = pre_ref[0]                                            # (C_pad, HW_pad)
    post = post_ref[0]

    # Global average pool (the 1/HW is folded into w1*): lane-axis reduce.
    sum_pre = jnp.sum(pre.astype(jnp.float32), axis=1, keepdims=True)   # (C_pad, 1)
    sum_post = jnp.sum(post.astype(jnp.float32), axis=1, keepdims=True)

    # 1x1 conv #1 + ReLU as VPU broadcast-mul + sublane reduce (no MXU).
    hidden = jnp.sum(w1p_ref[...] * sum_pre + w1q_ref[...] * sum_post,
                     axis=0, keepdims=True) + b1_ref[...]                # (1, Cr)
    hidden = jnp.maximum(hidden, 0.0)

    # 1x1 conv #2 + Sigmoid: lane-axis reduce back to per-channel columns.
    attn_pre = jax.nn.sigmoid(
        jnp.sum(w2p_ref[...] * hidden, axis=1, keepdims=True) + b2p_ref[...])   # (C_pad, 1)
    attn_post = jax.nn.sigmoid(
        jnp.sum(w2q_ref[...] * hidden, axis=1, keepdims=True) + b2q_ref[...])

    out_ref[0] = (pre * attn_pre + post * attn_post).astype(out_ref.dtype)


def _pool_mlp_kernel(pre_ref, post_ref, w1p_ref, w1q_ref, b1_ref,
                     w2p_ref, w2q_ref, b2p_ref, b2q_ref,
                     attn_pre_ref, attn_post_ref,
                     sum_pre, sum_post):
    """Tiled path, pass 1: accumulate channel sums over spatial tiles, then
    run the tiny MLP and emit per-channel attention weights."""
    t = pl.program_id(1)

    @pl.when(t == 0)
    def _():
        sum_pre[...] = jnp.zeros_like(sum_pre)
        sum_post[...] = jnp.zeros_like(sum_post)

    sum_pre[...] += jnp.sum(pre_ref[0].astype(jnp.float32), axis=1, keepdims=True)
    sum_post[...] += jnp.sum(post_ref[0].astype(jnp.float32), axis=1, keepdims=True)

    @pl.when(t == pl.num_programs(1) - 1)
    def _():
        hidden = jnp.sum(w1p_ref[...] * sum_pre[...] + w1q_ref[...] * sum_post[...],
                         axis=0, keepdims=True) + b1_ref[...]            # (1, Cr)
        hidden = jnp.maximum(hidden, 0.0)
        attn_pre_ref[0] = jax.nn.sigmoid(
            jnp.sum(w2p_ref[...] * hidden, axis=1, keepdims=True) + b2p_ref[...])
        attn_post_ref[0] = jax.nn.sigmoid(
            jnp.sum(w2q_ref[...] * hidden, axis=1, keepdims=True) + b2q_ref[...])


def _apply_kernel(pre_ref, post_ref, ap_ref, aq_ref, out_ref):
    """Tiled path, pass 2: elementwise apply of the attention weights."""
    out_ref[0] = (pre_ref[0] * ap_ref[0] + post_ref[0] * aq_ref[0]).astype(out_ref.dtype)


# --------------------------------------------------------------------------
# wrapper
# --------------------------------------------------------------------------

def channel_attention_fusion(pre_feat, post_feat, w1, b1, w2, b2,
                             *, force_tiled=None, hw_tile=None):
    """pre_feat, post_feat: (B, C, H, W) float32 (NCHW, like PyTorch).

    w1: (C//8, 2C), b1: (C//8,), w2: (2C, C//8), b2: (2C,)  — the two 1x1 convs.
    """
    B, C, H, W = pre_feat.shape
    assert post_feat.shape == pre_feat.shape
    assert C >= 8, "channels must be >= 8 so that channels // 8 >= 1"
    Cr = C // 8
    assert w1.shape == (Cr, 2 * C) and b1.shape == (Cr,)
    assert w2.shape == (2 * C, Cr) and b2.shape == (2 * C,)

    HW = H * W
    C_pad = _round_up(C, 8)
    HW_128 = _round_up(HW, 128)
    itemsize = jnp.dtype(pre_feat.dtype).itemsize

    budget = _vmem_budget_bytes()
    # Full-residency footprint: pre/post/out blocks double-buffered + tiny weights.
    full_bytes = (3 * 2 * C_pad * HW_128 * itemsize
                  + 2 * (4 * C_pad * Cr + Cr + 2 * C_pad) * 4)
    # Prefer the tiled path when full residency would not fit, or when the
    # batch grid is too short to keep the pipeline busy and tiling actually
    # yields many steps (v7x: 2 TCs want >= ~4 steps each).
    few_batch_steps = (B < 4) and (HW_128 >= 8 * 1024)
    use_tiled = (full_bytes > budget) or few_batch_steps
    if force_tiled is not None:
        use_tiled = bool(force_tiled)

    w1p, w1q, b1r, w2p, w2q, b2p, b2q = _prep_weights(w1, b1, w2, b2, C, C_pad, HW)

    pre_flat = pre_feat.reshape(B, C, HW)
    post_flat = post_feat.reshape(B, C, HW)

    # ---------------- full-image-resident path (grid over batch) ----------
    if not use_tiled:
        HW_pad = HW_128
        pre_p = jnp.pad(pre_flat, ((0, 0), (0, C_pad - C), (0, HW_pad - HW)))
        post_p = jnp.pad(post_flat, ((0, 0), (0, C_pad - C), (0, HW_pad - HW)))
        vmem_limit = int(min(budget,
                             max(int(full_bytes * 1.25) + (2 << 20), 32 << 20)))

        out_p = pl.pallas_call(
            _fused_kernel,
            out_shape=jax.ShapeDtypeStruct((B, C_pad, HW_pad), pre_feat.dtype),
            grid_spec=pltpu.PrefetchScalarGridSpec(
                num_scalar_prefetch=0,
                grid=(B,),
                in_specs=[
                    pl.BlockSpec((1, C_pad, HW_pad), lambda b: (b, 0, 0)),
                    pl.BlockSpec((1, C_pad, HW_pad), lambda b: (b, 0, 0)),
                    pl.BlockSpec((C_pad, Cr), lambda b: (0, 0)),
                    pl.BlockSpec((C_pad, Cr), lambda b: (0, 0)),
                    pl.BlockSpec((1, Cr), lambda b: (0, 0)),
                    pl.BlockSpec((C_pad, Cr), lambda b: (0, 0)),
                    pl.BlockSpec((C_pad, Cr), lambda b: (0, 0)),
                    pl.BlockSpec((C_pad, 1), lambda b: (0, 0)),
                    pl.BlockSpec((C_pad, 1), lambda b: (0, 0)),
                ],
                out_specs=pl.BlockSpec((1, C_pad, HW_pad), lambda b: (b, 0, 0)),
            ),
            compiler_params=pltpu.CompilerParams(
                dimension_semantics=("parallel",),
                vmem_limit_bytes=vmem_limit),
        )(pre_p, post_p, w1p, w1q, b1r, w2p, w2q, b2p, b2q)
        return out_p[:, :C, :HW].reshape(B, C, H, W)

    # ---------------- spatially tiled two-pass path ------------------------
    if hw_tile is None:
        max_t = budget // (8 * C_pad * itemsize)     # in+out, double buffers, slack
        hw_tile = (max_t // 128) * 128
        # aim for several grid steps along the spatial axis when possible
        hw_tile = min(hw_tile, max(128, (HW_128 // 4 // 128) * 128), 4096)
    hw_tile = max(128, (int(hw_tile) // 128) * 128)
    hw_tile = min(hw_tile, HW_128)
    HW_pad = _round_up(HW, hw_tile)
    n_t = HW_pad // hw_tile

    pre_p = jnp.pad(pre_flat, ((0, 0), (0, C_pad - C), (0, HW_pad - HW)))
    post_p = jnp.pad(post_flat, ((0, 0), (0, C_pad - C), (0, HW_pad - HW)))

    tile_bytes = 3 * 2 * C_pad * hw_tile * itemsize + (1 << 20)
    vmem_limit = int(min(budget, max(int(tile_bytes * 1.5), 32 << 20)))

    # Pass 1: pool + tiny MLP -> per-channel attention columns (B, C_pad, 1).
    attn_pre, attn_post = pl.pallas_call(
        _pool_mlp_kernel,
        out_shape=(jax.ShapeDtypeStruct((B, C_pad, 1), jnp.float32),
                   jax.ShapeDtypeStruct((B, C_pad, 1), jnp.float32)),
        grid_spec=pltpu.PrefetchScalarGridSpec(
            num_scalar_prefetch=0,
            grid=(B, n_t),
            in_specs=[
                pl.BlockSpec((1, C_pad, hw_tile), lambda b, t: (b, 0, t)),
                pl.BlockSpec((1, C_pad, hw_tile), lambda b, t: (b, 0, t)),
                pl.BlockSpec((C_pad, Cr), lambda b, t: (0, 0)),
                pl.BlockSpec((C_pad, Cr), lambda b, t: (0, 0)),
                pl.BlockSpec((1, Cr), lambda b, t: (0, 0)),
                pl.BlockSpec((C_pad, Cr), lambda b, t: (0, 0)),
                pl.BlockSpec((C_pad, Cr), lambda b, t: (0, 0)),
                pl.BlockSpec((C_pad, 1), lambda b, t: (0, 0)),
                pl.BlockSpec((C_pad, 1), lambda b, t: (0, 0)),
            ],
            out_specs=(pl.BlockSpec((1, C_pad, 1), lambda b, t: (b, 0, 0)),
                       pl.BlockSpec((1, C_pad, 1), lambda b, t: (b, 0, 0))),
            scratch_shapes=[pltpu.VMEM((C_pad, 1), jnp.float32),
                            pltpu.VMEM((C_pad, 1), jnp.float32)]),
        compiler_params=pltpu.CompilerParams(
            dimension_semantics=("parallel", "arbitrary"),
            vmem_limit_bytes=vmem_limit),
    )(pre_p, post_p, w1p, w1q, b1r, w2p, w2q, b2p, b2q)

    # Pass 2: tiled elementwise apply.
    out_p = pl.pallas_call(
        _apply_kernel,
        out_shape=jax.ShapeDtypeStruct((B, C_pad, HW_pad), pre_feat.dtype),
        grid_spec=pltpu.PrefetchScalarGridSpec(
            num_scalar_prefetch=0,
            grid=(B, n_t),
            in_specs=[
                pl.BlockSpec((1, C_pad, hw_tile), lambda b, t: (b, 0, t)),
                pl.BlockSpec((1, C_pad, hw_tile), lambda b, t: (b, 0, t)),
                pl.BlockSpec((1, C_pad, 1), lambda b, t: (b, 0, 0)),
                pl.BlockSpec((1, C_pad, 1), lambda b, t: (b, 0, 0)),
            ],
            out_specs=pl.BlockSpec((1, C_pad, hw_tile), lambda b, t: (b, 0, t)),
        ),
        compiler_params=pltpu.CompilerParams(
            dimension_semantics=("parallel", "parallel"),
            vmem_limit_bytes=vmem_limit),
    )(pre_p, post_p, attn_pre, attn_post)

    return out_p[:, :C, :HW].reshape(B, C, H, W)


# --------------------------------------------------------------------------
# reference + test
# --------------------------------------------------------------------------

def _reference(pre_feat, post_feat, w1, b1, w2, b2):
    # Pure-JAX reference mirroring the PyTorch forward.
    C = pre_feat.shape[1]
    combined = jnp.concatenate([pre_feat, post_feat], axis=1)          # (B, 2C, H, W)
    pooled = jnp.mean(combined, axis=(2, 3))                           # (B, 2C)
    hidden = jnp.maximum(pooled @ w1.T + b1, 0.0)                      # (B, C//8)
    attn = jax.nn.sigmoid(hidden @ w2.T + b2)                          # (B, 2C)
    pre_attn = attn[:, :C][:, :, None, None]
    post_attn = attn[:, C:][:, :, None, None]
    return pre_feat * pre_attn + post_feat * post_attn


if __name__ == "__main__":
    B, C, H, W = 2, 16, 16, 16   # C//8 = 2, 2C = 32
    key = jax.random.PRNGKey(0)
    k_pre, k_post, k_w1, k_b1, k_w2, k_b2 = jax.random.split(key, 6)

    pre_feat = jax.random.normal(k_pre, (B, C, H, W), dtype=jnp.float32)
    post_feat = jax.random.normal(k_post, (B, C, H, W), dtype=jnp.float32)

    # Conv2d(2C, C//8, 1): weight (C//8, 2C, 1, 1) -> (C//8, 2C); bias (C//8,)
    w1 = jax.random.normal(k_w1, (C // 8, 2 * C), dtype=jnp.float32) * 0.1
    b1 = jax.random.normal(k_b1, (C // 8,), dtype=jnp.float32) * 0.1
    # Conv2d(C//8, 2C, 1): weight (2C, C//8, 1, 1) -> (2C, C//8); bias (2C,)
    w2 = jax.random.normal(k_w2, (2 * C, C // 8), dtype=jnp.float32) * 0.1
    b2 = jax.random.normal(k_b2, (2 * C,), dtype=jnp.float32) * 0.1

    ref = _reference(pre_feat, post_feat, w1, b1, w2, b2)

    # Auto-selected path (full-image-resident at this small size).
    out = channel_attention_fusion(pre_feat, post_feat, w1, b1, w2, b2)
    out = jax.block_until_ready(out)
    assert out.shape == (B, C, H, W)
    assert jnp.allclose(out, ref, atol=1e-5, rtol=1e-5), "mismatch (full path)"

    # Also exercise the spatially tiled two-pass fallback (used on v7x / big shapes).
    out_tiled = channel_attention_fusion(pre_feat, post_feat, w1, b1, w2, b2,
                                         force_tiled=True, hw_tile=128)
    out_tiled = jax.block_until_ready(out_tiled)
    assert jnp.allclose(out_tiled, ref, atol=1e-5, rtol=1e-5), "mismatch (tiled path)"

    # Non-lane-aligned spatial shape to check the padding logic (HW=100 -> 128).
    Hn, Wn = 10, 10
    pre_n = jax.random.normal(k_pre, (B, C, Hn, Wn), dtype=jnp.float32)
    post_n = jax.random.normal(k_post, (B, C, Hn, Wn), dtype=jnp.float32)
    out_n = jax.block_until_ready(
        channel_attention_fusion(pre_n, post_n, w1, b1, w2, b2))
    assert jnp.allclose(out_n, _reference(pre_n, post_n, w1, b1, w2, b2),
                        atol=1e-5, rtol=1e-5), "mismatch (padded path)"

    print("KERNEL_OK")
</pallas_src>

<mosaic_0001>
module attributes {stable_mosaic.version = 11 : i64} {
  func.func @_fused_kernel(%arg0: i32, %arg1: memref<1x16x256xf32, #tpu.memory_space<vmem>>, %arg2: memref<1x16x256xf32, #tpu.memory_space<vmem>>, %arg3: memref<16x2xf32, #tpu.memory_space<vmem>>, %arg4: memref<16x2xf32, #tpu.memory_space<vmem>>, %arg5: memref<1x2xf32, #tpu.memory_space<vmem>>, %arg6: memref<16x2xf32, #tpu.memory_space<vmem>>, %arg7: memref<16x2xf32, #tpu.memory_space<vmem>>, %arg8: memref<16x1xf32, #tpu.memory_space<vmem>>, %arg9: memref<16x1xf32, #tpu.memory_space<vmem>>, %arg10: memref<1x16x256xf32, #tpu.memory_space<vmem>>) attributes {dimension_semantics = [#tpu.dimension_semantics<parallel>], iteration_bounds = array<i64: 2>, scalar_prefetch = 0 : i64, scratch_operands = 0 : i64, tpu.core_type = #tpu.core_type<tc>, window_params = [{transform_indices = @transform_0, window_bounds = array<i64: 1, 16, 256>}, {transform_indices = @transform_1, window_bounds = array<i64: 1, 16, 256>}, {pipeline_mode = #tpu.pipeline_mode<synchronous>, transform_indices = @transform_2, window_bounds = array<i64: 16, 2>}, {pipeline_mode = #tpu.pipeline_mode<synchronous>, transform_indices = @transform_3, window_bounds = array<i64: 16, 2>}, {pipeline_mode = #tpu.pipeline_mode<synchronous>, transform_indices = @transform_4, window_bounds = array<i64: 1, 2>}, {pipeline_mode = #tpu.pipeline_mode<synchronous>, transform_indices = @transform_5, window_bounds = array<i64: 16, 2>}, {pipeline_mode = #tpu.pipeline_mode<synchronous>, transform_indices = @transform_6, window_bounds = array<i64: 16, 2>}, {pipeline_mode = #tpu.pipeline_mode<synchronous>, transform_indices = @transform_7, window_bounds = array<i64: 16, 1>}, {pipeline_mode = #tpu.pipeline_mode<synchronous>, transform_indices = @transform_8, window_bounds = array<i64: 16, 1>}, {transform_indices = @transform_9, window_bounds = array<i64: 1, 16, 256>}]} {
    %c0 = arith.constant 0 : index
    %c0_0 = arith.constant 0 : index
    %c0_1 = arith.constant 0 : index
    %0 = vector.load %arg1[%c0, %c0_0, %c0_1] : memref<1x16x256xf32, #tpu.memory_space<vmem>>, vector<1x16x256xf32>
    %1 = vector.shape_cast %0 : vector<1x16x256xf32> to vector<16x256xf32>
    %c0_2 = arith.constant 0 : index
    %c0_3 = arith.constant 0 : index
    %c0_4 = arith.constant 0 : index
    %2 = vector.load %arg2[%c0_2, %c0_3, %c0_4] : memref<1x16x256xf32, #tpu.memory_space<vmem>>, vector<1x16x256xf32>
    %3 = vector.shape_cast %2 : vector<1x16x256xf32> to vector<16x256xf32>
    %cst = arith.constant dense<0.000000e+00> : vector<16xf32>
    %4 = vector.multi_reduction <add>, %1, %cst [1] : vector<16x256xf32> to vector<16xf32>
    %5 = vector.shape_cast %4 : vector<16xf32> to vector<16x1xf32>
    %cst_5 = arith.constant dense<0.000000e+00> : vector<16xf32>
    %6 = vector.multi_reduction <add>, %3, %cst_5 [1] : vector<16x256xf32> to vector<16xf32>
    %7 = vector.shape_cast %6 : vector<16xf32> to vector<16x1xf32>
    %c0_6 = arith.constant 0 : index
    %c0_7 = arith.constant 0 : index
    %8 = vector.load %arg3[%c0_6, %c0_7] : memref<16x2xf32, #tpu.memory_space<vmem>>, vector<16x2xf32>
    %9 = vector.broadcast %5 : vector<16x1xf32> to vector<16x2xf32>
    %10 = arith.mulf %8, %9 : vector<16x2xf32>
    %c0_8 = arith.constant 0 : index
    %c0_9 = arith.constant 0 : index
    %11 = vector.load %arg4[%c0_8, %c0_9] : memref<16x2xf32, #tpu.memory_space<vmem>>, vector<16x2xf32>
    %12 = vector.broadcast %7 : vector<16x1xf32> to vector<16x2xf32>
    %13 = arith.mulf %11, %12 : vector<16x2xf32>
    %14 = arith.addf %10, %13 : vector<16x2xf32>
    %cst_10 = arith.constant dense<0.000000e+00> : vector<2xf32>
    %15 = vector.multi_reduction <add>, %14, %cst_10 [0] : vector<16x2xf32> to vector<2xf32>
    %16 = vector.shape_cast %15 : vector<2xf32> to vector<1x2xf32>
    %c0_11 = arith.constant 0 : index
    %c0_12 = arith.constant 0 : index
    %17 = vector.load %arg5[%c0_11, %c0_12] : memref<1x2xf32, #tpu.memory_space<vmem>>, vector<1x2xf32>
    %18 = arith.addf %16, %17 : vector<1x2xf32>
    %cst_13 = arith.constant 0.000000e+00 : f32
    %19 = vector.broadcast %cst_13 : f32 to vector<1x2xf32>
    %20 = arith.maximumf %18, %19 : vector<1x2xf32>
    %c0_14 = arith.constant 0 : index
    %c0_15 = arith.constant 0 : index
    %21 = vector.load %arg6[%c0_14, %c0_15] : memref<16x2xf32, #tpu.memory_space<vmem>>, vector<16x2xf32>
    %22 = vector.broadcast %20 : vector<1x2xf32> to vector<16x2xf32>
    %23 = arith.mulf %21, %22 : vector<16x2xf32>
    %cst_16 = arith.constant dense<0.000000e+00> : vector<16xf32>
    %24 = vector.multi_reduction <add>, %23, %cst_16 [1] : vector<16x2xf32> to vector<16xf32>
    %25 = vector.shape_cast %24 : vector<16xf32> to vector<16x1xf32>
    %c0_17 = arith.constant 0 : index
    %c0_18 = arith.constant 0 : index
    %26 = vector.load %arg8[%c0_17, %c0_18] : memref<16x1xf32, #tpu.memory_space<vmem>>, vector<16x1xf32>
    %27 = arith.addf %25, %26 : vector<16x1xf32>
    %28 = arith.negf %27 : vector<16x1xf32>
    %29 = math.exp %28 : vector<16x1xf32>
    %cst_19 = arith.constant 1.000000e+00 : f32
    %30 = vector.broadcast %cst_19 : f32 to vector<16x1xf32>
    %31 = arith.addf %30, %29 : vector<16x1xf32>
    %32 = arith.divf %30, %31 : vector<16x1xf32>
    %c0_20 = arith.constant 0 : index
    %c0_21 = arith.constant 0 : index
    %33 = vector.load %arg7[%c0_20, %c0_21] : memref<16x2xf32, #tpu.memory_space<vmem>>, vector<16x2xf32>
    %34 = vector.broadcast %20 : vector<1x2xf32> to vector<16x2xf32>
    %35 = arith.mulf %33, %34 : vector<16x2xf32>
    %cst_22 = arith.constant dense<0.000000e+00> : vector<16xf32>
    %36 = vector.multi_reduction <add>, %35, %cst_22 [1] : vector<16x2xf32> to vector<16xf32>
    %37 = vector.shape_cast %36 : vector<16xf32> to vector<16x1xf32>
    %c0_23 = arith.constant 0 : index
    %c0_24 = arith.constant 0 : index
    %38 = vector.load %arg9[%c0_23, %c0_24] : memref<16x1xf32, #tpu.memory_space<vmem>>, vector<16x1xf32>
    %39 = arith.addf %37, %38 : vector<16x1xf32>
    %40 = arith.negf %39 : vector<16x1xf32>
    %41 = math.exp %40 : vector<16x1xf32>
    %cst_25 = arith.constant 1.000000e+00 : f32
    %42 = vector.broadcast %cst_25 : f32 to vector<16x1xf32>
    %43 = arith.addf %42, %41 : vector<16x1xf32>
    %44 = arith.divf %42, %43 : vector<16x1xf32>
    %45 = vector.broadcast %32 : vector<16x1xf32> to vector<16x256xf32>
    %46 = arith.mulf %1, %45 : vector<16x256xf32>
    %47 = vector.broadcast %44 : vector<16x1xf32> to vector<16x256xf32>
    %48 = arith.mulf %3, %47 : vector<16x256xf32>
    %49 = arith.addf %46, %48 : vector<16x256xf32>
    %c0_26 = arith.constant 0 : index
    %c0_27 = arith.constant 0 : index
    %c0_28 = arith.constant 0 : index
    %50 = vector.load %arg10[%c0_26, %c0_27, %c0_28] : memref<1x16x256xf32, #tpu.memory_space<vmem>>, vector<1x16x256xf32>
    %51 = vector.shape_cast %50 : vector<1x16x256xf32> to vector<16x256xf32>
    %52 = vector.shape_cast %49 : vector<16x256xf32> to vector<1x16x256xf32>
    tpu.vector_store %arg10[%c0_26, %c0_27, %c0_28], %52 {strides = array<i32>} : memref<1x16x256xf32, #tpu.memory_space<vmem>>, vector<1x16x256xf32>,
    return
  }
  func.func @transform_0(%arg0: i32) -> (i32, i32, i32) {
    %c0_i32 = arith.constant 0 : i32
    %c0_i32_0 = arith.constant 0 : i32
    %c0_i32_1 = arith.constant 0 : i32
    return %arg0, %c0_i32, %c0_i32_0 : i32, i32, i32
  }
  func.func @transform_1(%arg0: i32) -> (i32, i32, i32) {
    %c0_i32 = arith.constant 0 : i32
    %c0_i32_0 = arith.constant 0 : i32
    %c0_i32_1 = arith.constant 0 : i32
    return %arg0, %c0_i32, %c0_i32_0 : i32, i32, i32
  }
  func.func @transform_2(%arg0: i32) -> (i32, i32) {
    %c0_i32 = arith.constant 0 : i32
    %c0_i32_0 = arith.constant 0 : i32
    %c0_i32_1 = arith.constant 0 : i32
    return %c0_i32, %c0_i32_0 : i32, i32
  }
  func.func @transform_3(%arg0: i32) -> (i32, i32) {
    %c0_i32 = arith.constant 0 : i32
    %c0_i32_0 = arith.constant 0 : i32
    %c0_i32_1 = arith.constant 0 : i32
    return %c0_i32, %c0_i32_0 : i32, i32
  }
  func.func @transform_4(%arg0: i32) -> (i32, i32) {
    %c0_i32 = arith.constant 0 : i32
    %c0_i32_0 = arith.constant 0 : i32
    %c0_i32_1 = arith.constant 0 : i32
    return %c0_i32, %c0_i32_0 : i32, i32
  }
  func.func @transform_5(%arg0: i32) -> (i32, i32) {
    %c0_i32 = arith.constant 0 : i32
    %c0_i32_0 = arith.constant 0 : i32
    %c0_i32_1 = arith.constant 0 : i32
    return %c0_i32, %c0_i32_0 : i32, i32
  }
  func.func @transform_6(%arg0: i32) -> (i32, i32) {
    %c0_i32 = arith.constant 0 : i32
    %c0_i32_0 = arith.constant 0 : i32
    %c0_i32_1 = arith.constant 0 : i32
    return %c0_i32, %c0_i32_0 : i32, i32
  }
  func.func @transform_7(%arg0: i32) -> (i32, i32) {
    %c0_i32 = arith.constant 0 : i32
    %c0_i32_0 = arith.constant 0 : i32
    %c0_i32_1 = arith.constant 0 : i32
    return %c0_i32, %c0_i32_0 : i32, i32
  }
  func.func @transform_8(%arg0: i32) -> (i32, i32) {
    %c0_i32 = arith.constant 0 : i32
    %c0_i32_0 = arith.constant 0 : i32
    %c0_i32_1 = arith.constant 0 : i32
    return %c0_i32, %c0_i32_0 : i32, i32
  }
  func.func @transform_9(%arg0: i32) -> (i32, i32, i32) {
    %c0_i32 = arith.constant 0 : i32
    %c0_i32_0 = arith.constant 0 : i32
    %c0_i32_1 = arith.constant 0 : i32
    return %arg0, %c0_i32, %c0_i32_0 : i32, i32, i32
  }
}

</mosaic_0001>

<bundles_post_ra>
// kernel: tpu_custom_call.1
= control target key start
LH: loop header
LB: loop body
LE: loop exit
PB: predicated region body
PF: predicated region fallthrough
CT: control target
= control target key end

     0   :  { %14 = vsyncpa [#allocation3], 0  ;;  %s1100_s0 = inlined_call_operand.vmem [shape: f32[2,16,256], index: 0, kind: input, shape index: {}]   ;;  %s1101_s1 = inlined_call_operand.hbm [shape: f32[2,16,256], index: 1, kind: input, shape index: {}]   ;;  %s1102_s2 = inlined_call_operand.vmem [shape: f32[16,2], index: 2, kind: input, shape index: {}]   ;;  %s1103_s3 = inlined_call_operand.vmem [shape: f32[16,2], index: 3, kind: input, shape index: {}]   ;;  %s1104_s4 = inlined_call_operand.vmem [shape: f32[1,2], index: 4, kind: input, shape index: {}]   ;;  %s1105_s5 = inlined_call_operand.vmem [shape: f32[16,2], index: 5, kind: input, shape index: {}]   ;;  %s1106_s6 = inlined_call_operand.vmem [shape: f32[16,2], index: 6, kind: input, shape index: {}]   ;;  %s1107_s7 = inlined_call_operand.vmem [shape: f32[16,1], index: 7, kind: input, shape index: {}]   ;;  %s1108_s8 = inlined_call_operand.vmem [shape: f32[16,1], index: 8, kind: input, shape index: {}]   ;;  %s1109_s9 = inlined_call_operand.hbm [shape: f32[2,16,256], index: 9, kind: output, shape index: {}]  }
   0x1   :  { %16 = vsyncpa [#allocation3 + $0x1], 0 }
   0x2   :  { %17 = vsyncpa [#allocation4], 0 }
   0x3   :  { %19 = vsyncpa [#allocation4 + $0x1], 0  ;;  %s852_s30 = smov 0   ;;  %s854_s10 = smov 0  }
   0x4   :  { %s856_s11 = smov 0   ;;  %s858_s12 = smov 0  }
   0x5 LB: > { %s873_s13 = sadd.s32 4294967295, %s793_s12   ;;  %s605_s14 = sadd.s32 4294967294, %s793_s12   ;;  %s793_s12 = sphi %s858_s12, %s1122_s12   ;;  %s789_s11 = sphi %s856_s11, %s1121_s11   ;;  %s785_s10 = sphi %s854_s10, %s1120_s10   ;;  %s781_s30 = sphi %s852_s30, %s1119_s30  }
   0x6   : > { %s877_s15 = sadd.s32 1, %s793_s12   ;;  %s58_s16 = sadd.s32 1, %s789_s11 }
   0x7   : > { %s55_s17 = ssub.s32 %s793_s12, %s877_s15  ;;  %p65_p0 = scmp.ne.s32.totalorder %s789_s11, %s785_s10 }
   0x8   : > { %p56_p1 = scmp.eq.s32.totalorder %s55_s17, 0  ;;  %p66_p2 = scmp.eq.s32.totalorder %s793_s12, 0 }
   0x9   : > { %p71_p3 = scmp.ne.s32.totalorder %s785_s10, %s781_s30  ;;  %p72_p4 = scmp.eq.s32.totalorder %s873_s13, 0 }
   0xa   : > { %s889_s18 = scalar_select %p56_p1, %s789_s11, %s58_s16  }
   0xb   : > { %p891_p5 = por %p66_p2, %p65_p0  ;;  %p895_p6 = por %p72_p4, %p71_p3 }
   0xc   : > { %p242_p7 = scmp.eq.s32.totalorder %s873_s13, 1  ;;  %p248_p8 = scmp.eq.s32.totalorder %s605_s14, 1 }
   0xd   : > { %p640_p10 = scmp.lt.s32.totalorder %s793_s12, 2  ;;  %s297_s23 = sand.u32 1, %s789_s11  }
   0xe   : > { %p902_p11 = por %p242_p7, %p65_p0  ;;  %p906_p12 = por %p248_p8, %p71_p3 }
   0xf   : > { %s625_s24 = sshll.u32 %s793_s12, 9  ;;  %s608_s25 = sshll.u32 %s297_s23, 5 }
  0x10   : > { %s1113_s21 = scalar_select %p902_p11, 1, 0 }
  0x11   : > { %s1114_s22 = scalar_select %p906_p12, 1, 0 }
  0x12   : > { %s915_s28 = scalar_lea.hbm %s1101_s1, %s625_s24  ;;  %s301_s29 = scalar_lea.vmem [#allocation2], %s608_s25 }
  0x13   : > { %s308_s14 = sshll.u32 %s301_s29, 4  ;;  %p919_p13 = pnand %p640_p10, %p891_p5  ;;  %s923_s14 = int_to_ptr.vmem [resolvable:$true] %s308_s14 }
  0x14   : > { %s925_s17 = scalar_lea.sflag [#allocation3], %s297_s23  ;;  %s697_s26 = scalar_lea.hbm %s915_s28, 512 }
  0x15   : > { %p698_p0 = scmp.ne.s32.totalorder %s915_s28, %s697_s26  ;;  %p699_p1 = pneg %p919_p13 }
  0x16   : > { %s702_s25 = scalar_lea.hbm %s1101_s1, 1024  ;;  %p703_p4 = scmp.lt.u32.totalorder %s915_s28, %s1101_s1 }
  0x17   : > { %p700_p2 = pnand %p699_p1, %p698_p0  ;;  %p704_p5 = scmp.lt.u32.totalorder %s702_s25, %s697_s26 }
  0x18   : > { %p706_p8 = scmp.lt.u32.totalorder %s697_s26, %s915_s28 }
  0x19   : > { %p701_p3 = pneg %p700_p2  ;;  %p705_p7 = por %p704_p5, %p703_p4 }
  0x1b   : > { %p707_p10 = por %p706_p8, %p705_p7 }
  0x1d   : > { %p708_p9 = pnand %p707_p10, %p701_p3 }
  0x1f   : > { %711 = shalt.err (!%p708_p9)
}
  0x20   : > { %s712_s23 = scalar_lea.vmem %s923_s14, 512  ;;  %s795_s24 = smov [#allocation2]  }
  0x21   : > { %p713_p0 = scmp.ne.s32.totalorder %s923_s14, %s712_s23  ;;  %s717_s19 = sshll.u32 %s795_s24, 4  ;;  %s718_s19 = int_to_ptr.vmem [resolvable:$false] %s717_s19 }
  0x22   : > { %s719_s27 = scalar_lea.vmem %s718_s19, 1024  ;;  %p720_p11 = scmp.lt.s32.totalorder %s923_s14, %s718_s19 }
  0x23   : > { %p715_p2 = pnand %p713_p0, %p699_p1  ;;  %p721_p4 = scmp.lt.s32.totalorder %s719_s27, %s712_s23 }
  0x25   : > { %p716_p12 = pneg %p715_p2  ;;  %p722_p5 = por %p721_p4, %p720_p11 }
  0x27   : > { %p723_p7 = pnand %p722_p5, %p716_p12 }
  0x29   : > { %726 = shalt.err (!%p723_p7)
}
  0x2a   : > { %s796_s26 = smov 256   ;;  %s797_s25 = smov 16  }
  0x2b   : > { %635 = dma.hbm_to_vmem [thread:$0]  (!%p919_p13), %s915_s28, 512, %s923_s14, %s925_s17, %s796_s26, %s796_s26, %s797_s25  }
  0x2c   : > { %p611_p9 = scmp.ge.s32.totalorder %s793_s12, 1  ;;  %p316_p1 = scmp.lt.s32.totalorder %s793_s12, 3 }
  0x2e   : > { %p317_p3 = pnand %p611_p9, %p316_p1 }
  0x2f   : > { %s956_s29 = sand.u32 (!%p317_p3), 1, %s785_s10  }
  0x30   : > { %320 = sbr.rel (%p317_p3) target bundleno = 565 (0x235), region = 56  ;;  %s612_s23 = sshll.u32 (!%p317_p3), %s956_s29, 5 }
  0x31   : > { %s323_s24 = scalar_lea.sflag (!%p317_p3), [#allocation3], %s956_s29  ;;  %s326_s19 = scalar_lea.vmem (!%p317_p3), [#allocation2], %s612_s23 }
  0x37   : > { %772 = dma.done.wait (%p895_p6), %s323_s24, 512  }
  0x38   : > { %774 = vsyncadd (%p895_p6), %s323_s24, 4294966784  ;;  %p366_p11 = scmp.lt.s32.totalorder %s873_s13, 1  ;;  %v971_v0 = vld [vmem:[%s326_s19] sm:$0xff]  ;;  %v973_v1 = vld [vmem:[%s326_s19 + $0x8] sm:$0xff]  ;;  %vm401_vm0 = vcmask 15360   ;;  %v416_v32 = vlaneseq  ;;  %v798_v54 = vmov 0  }
  0x39   : > { %v385_v3 = vadd.f32 %v973_v1, %v971_v0  ;;  %v981_v5 = vld [vmem:[%s326_s19 + $0x10] sm:$0xff]  ;;  %v983_v6 = vld [vmem:[%s326_s19 + $0x18] sm:$0xff]  ;;  %v395_v12 = vld [vmem:[%s1103_s3] sm:$0xff]  ;;  %680 = vset.pattern.permute.xlu1 %v798_v54  ;;  %679 = vset.pattern.permute.xlu0 %v798_v54  ;;  %s627_s17 = sshll.u32 %s873_s13, 9  ;;  %s507_s20 = scalar_lea.sflag [#allocation4], %s956_s29 }
  0x3a   : > { %s367_s28 = scalar_select %p366_p11, %s873_s13, 1  ;;  %v388_v10 = vadd.f32 %v983_v6, %v981_v5  ;;  %v391_v13 = vld [vmem:[%s1102_s2] sm:$0xff]  ;;  %v396_v18 = vld [vmem:[%s1103_s3 + $0x8] sm:$0xff]  ;;  %v417_v35 = vshrl.u32 %v416_v32, 7 }
  0x3b   : > { %386 = vadd.xlane.f32.xlu1 %v385_v3  ;;  %v392_v19 = vld [vmem:[%s1102_s2 + $0x8] sm:$0xff]  ;;  %v411_v36 = vld [vmem:[%s1104_s4] sm:$0x1]  ;;  %s1056_s13 = scalar_lea.hbm %s1109_s9, %s627_s17  ;;  %p1116_p12 = scmp.ne.s32.totalorder %s1113_s21, 0 }
  0x3c   : > { %s626_s14 = sshll.u32 %s367_s28, 5  ;;  %v418_v39 = vsub.s32 0, %v417_v35  ;;  %v415_v41 = vld [vmem:[%s1105_s5 + $0x8] sm:$0xff]  ;;  %v414_v42 = vld [vmem:[%s1105_s5] sm:$0xff]  ;;  %s799_s25 = smov [#allocation5]  }
  0x3d   : > { %s370_s27 = scalar_lea.vmem %s1100_s0, %s626_s14  ;;  %v445_v44 = vld [vmem:[%s1106_s6 + $0x8] sm:$0xff]  ;;  %v444_v45 = vld [vmem:[%s1106_s6] sm:$0xff]  ;;  %s365_s14 = scalar_lea.vmem [#allocation5], %s612_s23 }
  0x3e   : > { %v975_v2 = vld [vmem:[%s370_s27] sm:$0xff]  ;;  %v979_v4 = vld [vmem:[%s370_s27 + $0x8] sm:$0xff]  ;;  %v987_v8 = vld [vmem:[%s370_s27 + $0x10] sm:$0xff]  ;;  %s520_s16 = sshll.u32 %s365_s14, 4  ;;  %s731_s24 = sshll.u32 %s799_s25, 4  ;;  %s1049_s16 = int_to_ptr.vmem [resolvable:$true] %s520_s16  ;;  %s732_s24 = int_to_ptr.vmem [resolvable:$false] %s731_s24 }
  0x3f   : > { %v379_v7 = vadd.f32 %v979_v4, %v975_v2  ;;  %v989_v9 = vld [vmem:[%s370_s27 + $0x18] sm:$0xff]  ;;  %389 = vadd.xlane.f32.xlu1 %v388_v10  ;;  %v429_v55 = vld [vmem:[%s1107_s7 + $0x8] sm:$0xff]  ;;  %v428_v56 = vld [vmem:[%s1107_s7] sm:$0xff]  ;;  %s727_s26 = scalar_lea.vmem %s1049_s16, 512  ;;  %s733_s19 = scalar_lea.vmem %s732_s24, 1024 }
  0x40   : > { %v382_v11 = vadd.f32 %v989_v9, %v987_v8  ;;  %v455_v61 = vld [vmem:[%s1108_s8 + $0x8] sm:$0xff]  ;;  %v454_v62 = vld [vmem:[%s1108_s8] sm:$0xff]  ;;  %p728_p6 = scmp.ne.s32.totalorder %s1049_s16, %s727_s26  ;;  %p734_p10 = scmp.lt.s32.totalorder %s1049_s16, %s732_s24 }
  0x41   : > { %380 = vadd.xlane.f32.xlu0 %v379_v7  ;;  %p735_p0 = scmp.lt.s32.totalorder %s733_s19, %s727_s26 }
  0x42   : > { %p729_p13 = pnand %p728_p6, %p1116_p12 }
  0x43   : > { %p736_p2 = por %p735_p0, %p734_p10 }
  0x44   : > { %p730_p8 = pneg %p729_p13 }
  0x45   : > { %383 = vadd.xlane.f32.xlu0 %v382_v11 }
  0x46   : > { %p737_p4 = pnand %p736_p2, %p730_p8 }
  0xc8   : > { %v387_v14 = vpop.xlane.xlu1 %386 }
  0xc9   : > { %v397_v16 = vmul.f32 %v395_v12, %v387_v14 }
  0xcc   : > { %v390_v20 = vpop.xlane.xlu1 %389 }
  0xcd   : > { %v398_v21 = vmul.f32 %v396_v18, %v390_v20 }
  0xce   : > { %v381_v15 = vpop.xlane.xlu0 %380 }
  0xcf   : > { %v393_v17 = vmul.f32 %v391_v13, %v381_v15 }
  0xd1   : > { %v399_v23 = vadd.f32 %v397_v16, %v393_v17 }
  0xd2   : > { %v384_v22 = vpop.xlane.xlu0 %383 }
  0xd3   : > { %v394_v24 = vmul.f32 %v392_v19, %v384_v22  ;;  %v402_v26 = vsel %vm401_vm0, %v399_v23, 0.0 }
  0xd5   : > { %v400_v25 = vadd.f32 %v398_v21, %v394_v24 }
  0xd7   : > { %v403_v27 = vsel %vm401_vm0, %v400_v25, 0.0 }
  0xd8   : > { %v404_v28 = vadd.f32 %v403_v27, %v402_v26 }
  0xda   : > { %v405_v29 = vrot.slane %v404_v28, 4 }
  0xdc   : > { %v406_v30 = vadd.f32 %v405_v29, %v404_v28 }
  0xde   : > { %v407_v31 = vrot.slane %v406_v30, 2 }
  0xe0   : > { %v408_v33 = vadd.f32 %v407_v31, %v406_v30 }
  0xe2   : > { %v409_v34 = vrot.slane %v408_v33, 1 }
  0xe4   : > { %v410_v37 = vadd.f32 %v409_v34, %v408_v33 }
  0xe6   : > { %v412_v38 = vadd.f32 %v411_v36, %v410_v37 }
  0xe8   : > { %v413_v40 = vmax.f32 %v412_v38, 0.0 }
  0xea   : > { %v419_v43 = vrot.slane %v413_v40, %v418_v39 }
  0xec   : > { %v421_v46 = vmul.f32 %v419_v43, %v415_v41  ;;  %v420_v47 = vmul.f32 %v419_v43, %v414_v42  ;;  %v447_v50 = vmul.f32 %v445_v44, %v419_v43  ;;  %v446_v51 = vmul.f32 %v444_v45, %v419_v43 }
  0xee   : > { %v425_v48 = vsel %vm401_vm0, %v421_v46, 0.0  ;;  %v422_v49 = vsel %vm401_vm0, %v420_v47, 0.0  ;;  %v451_v52 = vsel %vm401_vm0, %v447_v50, 0.0  ;;  %v448_v53 = vsel %vm401_vm0, %v446_v51, 0.0 }
  0xef   : > { %426 = vadd.xlane.f32.xlu1 %v425_v48  ;;  %423 = vadd.xlane.f32.xlu0 %v422_v49 }
  0xf3   : > { %452 = vadd.xlane.f32.xlu1 %v451_v52  ;;  %449 = vadd.xlane.f32.xlu0 %v448_v53 }
 0x17c   : > { %v427_v57 = vpop.xlane.xlu1 %426  ;;  %v424_v58 = vpop.xlane.xlu0 %423 }
 0x17d   : > { %v431_v59 = vadd.f32 %v429_v55, %v427_v57  ;;  %v430_v60 = vadd.f32 %v428_v56, %v424_v58 }
 0x17f   : > { %v617_v63 = vmul.f32 -1.442695, %v431_v59  ;;  %v616_v3 = vmul.f32 -1.442695, %v430_v60 }
 0x180   : > { %v453_v7 = vpop.xlane.xlu1 %452  ;;  %v450_v10 = vpop.xlane.xlu0 %449 }
 0x181   : > { %681 = vpow2.f32 %v617_v63  ;;  %v457_v11 = vadd.f32 %v455_v61, %v453_v7  ;;  %v456_v12 = vadd.f32 %v454_v62, %v450_v10 }
 0x182   : > { %683 = vpow2.f32 %v616_v3 }
 0x183   : > { %v619_v13 = vmul.f32 -1.442695, %v457_v11  ;;  %v618_v14 = vmul.f32 -1.442695, %v456_v12 }
 0x185   : > { %685 = vpow2.f32 %v619_v13 }
 0x186   : > { %687 = vpow2.f32 %v618_v14 }
 0x18b   : > { %v682_v15 = vpop.eup %681 }
 0x18c   : > { %v684_v16 = vpop.eup %683  ;;  %v439_v17 = vadd.f32 1.0, %v682_v15 }
 0x18d   : > { %v438_v18 = vadd.f32 1.0, %v684_v16 }
 0x18e   : > { %689 = vrcp.f32 %v439_v17 }
 0x18f   : > { %v686_v19 = vpop.eup %685  ;;  %691 = vrcp.f32 %v438_v18 }
 0x190   : > { %v688_v20 = vpop.eup %687  ;;  %v465_v22 = vadd.f32 1.0, %v686_v19 }
 0x191   : > { %v464_v21 = vadd.f32 1.0, %v688_v20 }
 0x193   : > { %693 = vrcp.f32 %v464_v21 }
 0x194   : > { %695 = vrcp.f32 %v465_v22 }
 0x198   : > { %v690_v23 = vpop.eup %689 }
 0x199   : > { %v692_v24 = vpop.eup %691  ;;  %477 = vperm.xlu1 %680, %v690_v23  }
 0x19a   : > { %472 = vperm.xlu0 %679, %v692_v24  }
 0x19d   : > { %v694_v25 = vpop.eup %693 }
 0x19e   : > { %486 = vperm.xlu1 %680, %v694_v25   ;;  %v696_v26 = vpop.eup %695 }
 0x1a2   : > { %491 = vperm.xlu1 %680, %v696_v26  }
 0x218   : > { %v478_v27 = vpop.permute.xlu1 %477 }
 0x219   : > { %v473_v28 = vpop.permute.xlu0 %472  ;;  %v482_v37 = vmul.f32 %v478_v27, %v987_v8  ;;  %v483_v38 = vmul.f32 %v478_v27, %v989_v9 }
 0x21a   : > { %v480_v30 = vmul.f32 %v473_v28, %v975_v2  ;;  %v481_v31 = vmul.f32 %v473_v28, %v979_v4 }
 0x21d   : > { %v487_v29 = vpop.permute.xlu1 %486 }
 0x21e   : > { %v494_v32 = vmul.f32 %v487_v29, %v971_v0  ;;  %v495_v33 = vmul.f32 %v487_v29, %v973_v1 }
 0x220   : > { %v498_v34 = vadd.f32 %v494_v32, %v480_v30  ;;  %v499_v35 = vadd.f32 %v495_v33, %v481_v31 }
 0x221   : > { %v492_v36 = vpop.permute.xlu1 %491 }
 0x222   : > { %502 = vst [vmem:[%s365_s14] sm:$0xff] %v498_v34  ;;  %503 = vst [vmem:[%s365_s14 + $0x8] sm:$0xff] %v499_v35  ;;  %v496_v0 = vmul.f32 %v492_v36, %v981_v5  ;;  %v497_v1 = vmul.f32 %v492_v36, %v983_v6 }
 0x224   : > { %v500_v2 = vadd.f32 %v496_v0, %v482_v37  ;;  %v501_v4 = vadd.f32 %v497_v1, %v483_v38 }
 0x226   : > { %504 = vst [vmem:[%s365_s14 + $0x10] sm:$0xff] %v500_v2  ;;  %505 = vst [vmem:[%s365_s14 + $0x18] sm:$0xff] %v501_v4 }
 0x227   : > { %740 = shalt.err (!%p737_p4)
}
 0x228   : > { %s741_s28 = scalar_lea.hbm %s1056_s13, 512  ;;  %s745_s23 = scalar_lea.hbm %s1109_s9, 1024 }
 0x229   : > { %p742_p5 = scmp.ne.s32.totalorder %s1056_s13, %s741_s28  ;;  %p746_p1 = scmp.lt.u32.totalorder %s1056_s13, %s1109_s9 }
 0x22a   : > { %p747_p3 = scmp.lt.u32.totalorder %s745_s23, %s741_s28  ;;  %p749_p6 = scmp.lt.u32.totalorder %s741_s28, %s1056_s13 }
 0x22b   : > { %p743_p7 = pnand %p742_p5, %p1116_p12 }
 0x22c   : > { %p748_p11 = por %p747_p3, %p746_p1 }
 0x22d   : > { %p744_p9 = pneg %p743_p7 }
 0x22e   : > { %p750_p13 = por %p749_p6, %p748_p11 }
 0x230   : > { %p751_p8 = pnand %p750_p13, %p744_p9 }
 0x232   : > { %754 = shalt.err (!%p751_p8)
}
 0x233   : > { %s800_s26 = smov 256   ;;  %s801_s24 = smov 16  }
 0x234   : > { %630 = dma.vmem_to_hbm [thread:$0]  (%p1116_p12), %s1049_s16, 512, %s1056_s13, %s507_s20, %s800_s26, %s800_s26, %s801_s24  }
 0x235 PF: > { %s535_s19 = sand.u32 1, %s781_s30   ;;  %p1117_p10 = scmp.ne.s32.totalorder %s1114_s22, 0 }
 0x236   : > { %p1118_p0 = scmp.ge.s32.totalorder %s793_s12, 2  ;;  %s536_s28 = scalar_lea.sflag [#allocation4], %s535_s19 }
 0x238   : > { %p637_p2 = pnand %p1118_p0, %p1117_p10 }
 0x23a   : > { %776 = dma.done.wait (!%p637_p2), %s536_s28, 512  }
 0x23b   : > { %778 = vsyncadd (!%p637_p2), %s536_s28, 4294966784  ;;  %p22_p4 = scmp.ge.s32.totalorder %s877_s15, 4   ;;  %s1119_s30 = smov %s785_s10 }
 0x23c   : > { %s1120_s10 = smov %s789_s11  ;;  %s1121_s11 = smov %s889_s18 }
 0x23d   : > { %s1122_s12 = smov %s877_s15  ;;  %24 = sbr.rel (!%p22_p4) target bundleno = 5 (0x5), region = 104 }
 0x244   :  { %541 = vsyncpa [#allocation3], 1 }
 0x245   :  { %543 = vsyncpa [#allocation3 + $0x1], 1 }
 0x246   :  { %544 = vsyncpa [#allocation4], 1 }
 0x247   :  { %546 = vsyncpa [#allocation4 + $0x1], 1 }

</bundles_post_ra>
